<compile_context>
chip_gen: v7x
topology: tpu7x:2x2x1
jax: 0.10.0
libtpu: 0.0.40
codegen_flags: <defaults>
</compile_context>

<pallas_src>
import functools

import jax
import jax.numpy as jnp
from jax.experimental import pallas as pl
from jax.experimental.pallas import tpu as pltpu


def _round_up(x: int, m: int) -> int:
    return ((x + m - 1) // m) * m


def _pick_vmem_limit() -> int:
    """48 MiB on v7x (64 MiB/TC physical), ~96 MiB on v5e/v6e (128 MiB physical)."""
    try:
        cap = pltpu.get_tpu_info().vmem_capacity_bytes
    except Exception:
        cap = 64 << 20  # conservative (v7x-safe) fallback
    return (96 << 20) if cap >= (100 << 20) else (48 << 20)


def _resident_spec(shape):
    """Weights/biases stay VMEM-resident (constant index_map); request a single
    buffer instead of the default double buffering to halve their footprint."""
    try:
        return pl.BlockSpec(shape, lambda i: (0, 0), pipeline_mode=pl.Buffered(1))
    except TypeError:  # older jax without pipeline_mode: fall back to default
        return pl.BlockSpec(shape, lambda i: (0, 0))


def _choose_block_batch(batch: int, cap_rows: int, floor: int) -> int:
    """Batch tile: >= floor rows (no 8-row cliff), MXU/sublane aligned, and prefer
    a size that divides the (8-aligned) batch so no batch padding is needed."""
    batch8 = _round_up(batch, 8)
    if batch8 <= floor:
        return batch8                       # whole batch in one tile
    blk = max(floor, min(cap_rows, 1024, batch8))
    blk = (blk // 8) * 8
    for align in (256, 128, 16, 8):         # MXU-pass / bf16-sublane friendly
        if blk >= align:
            blk = (blk // align) * align
            break
    for cand in range(blk, max(blk // 2, 8) - 1, -8):
        if batch8 % cand == 0:              # avoids padding the batch entirely
            return cand
    return blk


def _dobase_fwd_kernel(x_ref, we_ref, be_ref, wd_ref, bd_ref, recon_ref, z_ref):
    # Encode: MXU matmul in the operands' native dtype (bf16 or f32); f32 accumulate.
    h = jnp.dot(x_ref[...], we_ref[...],
                preferred_element_type=jnp.float32) + be_ref[...]
    z = jnp.tanh(h)                         # EUP, f32
    z_ref[...] = z.astype(z_ref.dtype)
    # Decode: cast z once to the decoder-weight dtype so this matmul is also native-rate.
    logits = jnp.dot(z.astype(wd_ref.dtype), wd_ref[...],
                     preferred_element_type=jnp.float32) + bd_ref[...]
    recon_ref[...] = jax.nn.sigmoid(logits).astype(recon_ref.dtype)


def prepare_dobase_params(w_enc, b_enc, w_dec, b_dec, *, weight_dtype=None):
    """One-time parameter prep (hoisted out of the per-call path): normalise biases to
    (1, n) f32, zero-pad feature dims to multiples of 128 (lane-dense, mathematically
    inert), and optionally cast the weights (bf16 recommended on v7x: full-rate MXU,
    half the VMEM residency & DMA)."""
    dim, hidden = w_enc.shape
    if weight_dtype is not None:
        w_enc = w_enc.astype(weight_dtype)
        w_dec = w_dec.astype(weight_dtype)
    b_enc = jnp.asarray(b_enc, jnp.float32).reshape(1, -1)
    b_dec = jnp.asarray(b_dec, jnp.float32).reshape(1, -1)
    dim_p, hidden_p = _round_up(dim, 128), _round_up(hidden, 128)
    if dim_p != dim or hidden_p != hidden:
        w_enc = jnp.pad(w_enc, ((0, dim_p - dim), (0, hidden_p - hidden)))
        w_dec = jnp.pad(w_dec, ((0, hidden_p - hidden), (0, dim_p - dim)))
        b_enc = jnp.pad(b_enc, ((0, 0), (0, hidden_p - hidden)))
        b_dec = jnp.pad(b_dec, ((0, 0), (0, dim_p - dim)))
    return w_enc, b_enc, w_dec, b_dec


def dobase_forward(x, w_enc_p, b_enc_p, w_dec_p, b_dec_p, *,
                   out_dim=None, out_hidden=None, block_batch=None):
    """Fused encode+decode forward. Expects parameters already padded by
    prepare_dobase_params(). Returns [reconstruction, latent]."""
    batch, dim_in = x.shape
    dim_p, hidden_p = w_enc_p.shape
    assert w_dec_p.shape == (hidden_p, dim_p)
    out_dim = dim_in if out_dim is None else out_dim
    out_hidden = hidden_p if out_hidden is None else out_hidden
    out_dtype = x.dtype

    vmem_limit = _pick_vmem_limit()

    # --- batch tile chosen against the SAME VMEM limit passed to the compiler ----
    it_x = jnp.dtype(x.dtype).itemsize
    it_o = jnp.dtype(out_dtype).itemsize
    resident = (w_enc_p.size * w_enc_p.dtype.itemsize          # single-buffered weights
                + w_dec_p.size * w_dec_p.dtype.itemsize
                + 4 * (b_enc_p.size + b_dec_p.size))
    per_row = 2 * (dim_p * it_x + dim_p * it_o + hidden_p * it_o)  # double-buffered streams
    avail = vmem_limit - resident - (4 << 20)                  # headroom for compiler scratch
    cap_rows = max((avail // per_row) // 8 * 8, 8)
    if block_batch is None:
        block_batch = _choose_block_batch(
            batch, cap_rows, floor=min(256, _round_up(batch, 8)))
    else:
        block_batch = max(8, min(_round_up(block_batch, 8), _round_up(batch, 8)))

    batch_p = _round_up(batch, block_batch)
    grid = (batch_p // block_batch,)

    # --- pad x only when actually needed (zero rows/cols are mathematically inert) --
    if batch_p != batch or dim_p != dim_in:
        x_in = jnp.pad(x, ((0, batch_p - batch), (0, dim_p - dim_in)))
    else:
        x_in = x

    recon_p, z_p = pl.pallas_call(
        _dobase_fwd_kernel,
        out_shape=(
            jax.ShapeDtypeStruct((batch_p, dim_p), out_dtype),     # reconstruction
            jax.ShapeDtypeStruct((batch_p, hidden_p), out_dtype),  # latent z
        ),
        grid_spec=pltpu.PrefetchScalarGridSpec(
            num_scalar_prefetch=0,
            grid=grid,
            in_specs=[
                pl.BlockSpec((block_batch, dim_p), lambda i: (i, 0)),  # x: streamed tiles
                _resident_spec((dim_p, hidden_p)),                     # W_enc: resident
                _resident_spec((1, hidden_p)),                         # b_enc: resident
                _resident_spec((hidden_p, dim_p)),                     # W_dec: resident
                _resident_spec((1, dim_p)),                            # b_dec: resident
            ],
            out_specs=[
                pl.BlockSpec((block_batch, dim_p), lambda i: (i, 0)),
                pl.BlockSpec((block_batch, hidden_p), lambda i: (i, 0)),
            ],
        ),
        compiler_params=pltpu.CompilerParams(
            dimension_semantics=("parallel",),   # shard batch tiles across TCs (v7x)
            vmem_limit_bytes=vmem_limit,
        ),
    )(x_in, w_enc_p, b_enc_p, w_dec_p, bd_p if (bd_p := b_dec_p) is not None else b_dec_p)

    # Strip padding only when padding was applied.
    recon = recon_p if (batch_p == batch and dim_p == out_dim) else recon_p[:batch, :out_dim]
    z = z_p if (batch_p == batch and hidden_p == out_hidden) else z_p[:batch, :out_hidden]
    return [recon, z]


def _reference_forward(x, w_enc, b_enc, w_dec, b_dec):
    x = x.astype(jnp.float32)
    z = jnp.tanh(x @ w_enc.astype(jnp.float32) + b_enc.astype(jnp.float32))
    recon = jax.nn.sigmoid(z @ w_dec.astype(jnp.float32) + b_dec.astype(jnp.float32))
    return [recon, z]


if __name__ == "__main__":
    key = jax.random.PRNGKey(0)
    k_x, k_we, k_be, k_wd, k_bd = jax.random.split(key, 5)

    # Small demo shapes (multiple batch tiles exercised via the bf16 run below).
    batch, dim, hidden = 64, 32, 16

    # Binary solution vectors in {-1, +1} (typical Deep Optimisation input domain).
    x = jnp.where(jax.random.uniform(k_x, (batch, dim)) > 0.5, 1.0, -1.0).astype(jnp.float32)

    w_enc = (0.1 * jax.random.normal(k_we, (dim, hidden))).astype(jnp.float32)
    b_enc = (0.1 * jax.random.normal(k_be, (hidden,))).astype(jnp.float32)
    w_dec = (0.1 * jax.random.normal(k_wd, (hidden, dim))).astype(jnp.float32)
    b_dec = (0.1 * jax.random.normal(k_bd, (dim,))).astype(jnp.float32)

    refs = _reference_forward(x, w_enc, b_enc, w_dec, b_dec)

    # --- f32 path: params padded once, auto batch tile (single tile here) ---------
    we_p, be_p, wd_p, bd_p = prepare_dobase_params(w_enc, b_enc, w_dec, b_dec)
    fwd = jax.jit(functools.partial(dobase_forward, out_dim=dim, out_hidden=hidden))
    outs = jax.block_until_ready(fwd(x, we_p, be_p, wd_p, bd_p))
    for o, r in zip(outs, refs):
        assert o.shape == r.shape, (o.shape, r.shape)
        assert jnp.max(jnp.abs(o.astype(jnp.float32) - r)) < 1e-4

    # --- bf16 activations + bf16 weights, f32 biases/accumulate; multi-tile grid ---
    we_b, be_b, wd_b, bd_b = prepare_dobase_params(
        w_enc, b_enc, w_dec, b_dec, weight_dtype=jnp.bfloat16)
    fwd_bf16 = jax.jit(functools.partial(
        dobase_forward, out_dim=dim, out_hidden=hidden, block_batch=32))
    outs_bf16 = jax.block_until_ready(
        fwd_bf16(x.astype(jnp.bfloat16), we_b, be_b, wd_b, bd_b))
    for o, r in zip(outs_bf16, refs):
        assert o.shape == r.shape, (o.shape, r.shape)
        assert jnp.max(jnp.abs(o.astype(jnp.float32) - r)) < 5e-2

    print("KERNEL_OK")
</pallas_src>

<mosaic_0001>
module attributes {stable_mosaic.version = 11 : i64} {
  func.func @_dobase_fwd_kernel(%arg0: i32, %arg1: memref<64x128xf32, #tpu.memory_space<vmem>>, %arg2: memref<128x128xf32, #tpu.memory_space<vmem>>, %arg3: memref<1x128xf32, #tpu.memory_space<vmem>>, %arg4: memref<128x128xf32, #tpu.memory_space<vmem>>, %arg5: memref<1x128xf32, #tpu.memory_space<vmem>>, %arg6: memref<64x128xf32, #tpu.memory_space<vmem>>, %arg7: memref<64x128xf32, #tpu.memory_space<vmem>>) attributes {dimension_semantics = [#tpu.dimension_semantics<parallel>], iteration_bounds = array<i64: 1>, scalar_prefetch = 0 : i64, scratch_operands = 0 : i64, tpu.core_type = #tpu.core_type<tc>, window_params = [{transform_indices = @transform_0, window_bounds = array<i64: 64, 128>}, {pipeline_mode = #tpu.pipeline_mode<synchronous>, transform_indices = @transform_1, window_bounds = array<i64: 128, 128>}, {pipeline_mode = #tpu.pipeline_mode<synchronous>, transform_indices = @transform_2, window_bounds = array<i64: 1, 128>}, {pipeline_mode = #tpu.pipeline_mode<synchronous>, transform_indices = @transform_3, window_bounds = array<i64: 128, 128>}, {pipeline_mode = #tpu.pipeline_mode<synchronous>, transform_indices = @transform_4, window_bounds = array<i64: 1, 128>}, {transform_indices = @transform_5, window_bounds = array<i64: 64, 128>}, {transform_indices = @transform_6, window_bounds = array<i64: 64, 128>}]} {
    %c0 = arith.constant 0 : index
    %c0_0 = arith.constant 0 : index
    %0 = vector.load %arg1[%c0, %c0_0] : memref<64x128xf32, #tpu.memory_space<vmem>>, vector<64x128xf32>
    %c0_1 = arith.constant 0 : index
    %c0_2 = arith.constant 0 : index
    %1 = vector.load %arg2[%c0_1, %c0_2] : memref<128x128xf32, #tpu.memory_space<vmem>>, vector<128x128xf32>
    %cst = arith.constant dense<0.000000e+00> : vector<64x128xf32>
    %2 = tpu.matmul %0, %1, %cst {dimension_numbers = #tpu.dot_dimension_numbers<[1], [0], [0], [1], [0, 0, 1, 1], [], []>} : vector<64x128xf32>, vector<128x128xf32>, vector<64x128xf32> -> vector<64x128xf32>
    %c0_3 = arith.constant 0 : index
    %c0_4 = arith.constant 0 : index
    %3 = vector.load %arg3[%c0_3, %c0_4] : memref<1x128xf32, #tpu.memory_space<vmem>>, vector<1x128xf32>
    %4 = vector.broadcast %3 : vector<1x128xf32> to vector<64x128xf32>
    %5 = arith.addf %2, %4 : vector<64x128xf32>
    %6 = math.tanh %5 : vector<64x128xf32>
    %c0_5 = arith.constant 0 : index
    %c0_6 = arith.constant 0 : index
    %7 = vector.load %arg7[%c0_5, %c0_6] : memref<64x128xf32, #tpu.memory_space<vmem>>, vector<64x128xf32>
    tpu.vector_store %arg7[%c0_5, %c0_6], %6 {strides = array<i32>} : memref<64x128xf32, #tpu.memory_space<vmem>>, vector<64x128xf32>,
    %c0_7 = arith.constant 0 : index
    %c0_8 = arith.constant 0 : index
    %8 = vector.load %arg4[%c0_7, %c0_8] : memref<128x128xf32, #tpu.memory_space<vmem>>, vector<128x128xf32>
    %cst_9 = arith.constant dense<0.000000e+00> : vector<64x128xf32>
    %9 = tpu.matmul %6, %8, %cst_9 {dimension_numbers = #tpu.dot_dimension_numbers<[1], [0], [0], [1], [0, 0, 1, 1], [], []>} : vector<64x128xf32>, vector<128x128xf32>, vector<64x128xf32> -> vector<64x128xf32>
    %c0_10 = arith.constant 0 : index
    %c0_11 = arith.constant 0 : index
    %10 = vector.load %arg5[%c0_10, %c0_11] : memref<1x128xf32, #tpu.memory_space<vmem>>, vector<1x128xf32>
    %11 = vector.broadcast %10 : vector<1x128xf32> to vector<64x128xf32>
    %12 = arith.addf %9, %11 : vector<64x128xf32>
    %13 = arith.negf %12 : vector<64x128xf32>
    %14 = math.exp %13 : vector<64x128xf32>
    %cst_12 = arith.constant 1.000000e+00 : f32
    %15 = vector.broadcast %cst_12 : f32 to vector<64x128xf32>
    %16 = arith.addf %15, %14 : vector<64x128xf32>
    %17 = arith.divf %15, %16 : vector<64x128xf32>
    %c0_13 = arith.constant 0 : index
    %c0_14 = arith.constant 0 : index
    %18 = vector.load %arg6[%c0_13, %c0_14] : memref<64x128xf32, #tpu.memory_space<vmem>>, vector<64x128xf32>
    tpu.vector_store %arg6[%c0_13, %c0_14], %17 {strides = array<i32>} : memref<64x128xf32, #tpu.memory_space<vmem>>, vector<64x128xf32>,
    return
  }
  func.func @transform_0(%arg0: i32) -> (i32, i32) {
    %c0_i32 = arith.constant 0 : i32
    %c0_i32_0 = arith.constant 0 : i32
    return %arg0, %c0_i32 : i32, i32
  }
  func.func @transform_1(%arg0: i32) -> (i32, i32) {
    %c0_i32 = arith.constant 0 : i32
    %c0_i32_0 = arith.constant 0 : i32
    %c0_i32_1 = arith.constant 0 : i32
    return %c0_i32, %c0_i32_0 : i32, i32
  }
  func.func @transform_2(%arg0: i32) -> (i32, i32) {
    %c0_i32 = arith.constant 0 : i32
    %c0_i32_0 = arith.constant 0 : i32
    %c0_i32_1 = arith.constant 0 : i32
    return %c0_i32, %c0_i32_0 : i32, i32
  }
  func.func @transform_3(%arg0: i32) -> (i32, i32) {
    %c0_i32 = arith.constant 0 : i32
    %c0_i32_0 = arith.constant 0 : i32
    %c0_i32_1 = arith.constant 0 : i32
    return %c0_i32, %c0_i32_0 : i32, i32
  }
  func.func @transform_4(%arg0: i32) -> (i32, i32) {
    %c0_i32 = arith.constant 0 : i32
    %c0_i32_0 = arith.constant 0 : i32
    %c0_i32_1 = arith.constant 0 : i32
    return %c0_i32, %c0_i32_0 : i32, i32
  }
  func.func @transform_5(%arg0: i32) -> (i32, i32) {
    %c0_i32 = arith.constant 0 : i32
    %c0_i32_0 = arith.constant 0 : i32
    return %arg0, %c0_i32 : i32, i32
  }
  func.func @transform_6(%arg0: i32) -> (i32, i32) {
    %c0_i32 = arith.constant 0 : i32
    %c0_i32_0 = arith.constant 0 : i32
    return %arg0, %c0_i32 : i32, i32
  }
}

</mosaic_0001>

<bundles_post_ra>
// kernel: dobase_forward.1
= control target key start
LH: loop header
LB: loop body
LE: loop exit
PB: predicated region body
PF: predicated region fallthrough
CT: control target
= control target key end

     0   :  { %12 = vsyncpa [#allocation3], 0  ;;  %s666_s21 = smov [#allocation2]   ;;  %s842_s0 = inlined_call_operand.vmem [shape: f32[64,128], index: 0, kind: input, shape index: {}]   ;;  %s843_s1 = inlined_call_operand.vmem [shape: f32[128,128], index: 1, kind: input, shape index: {}]   ;;  %s844_s2 = inlined_call_operand.vmem [shape: f32[1,128], index: 2, kind: input, shape index: {}]   ;;  %s845_s3 = inlined_call_operand.hbm [shape: f32[128,128], index: 3, kind: input, shape index: {}]   ;;  %s846_s4 = inlined_call_operand.vmem [shape: f32[1,128], index: 4, kind: input, shape index: {}]   ;;  %s847_s5 = inlined_call_operand.vmem [shape: f32[64,128], index: 5, kind: output, shape index: {0}]   ;;  %s848_s6 = inlined_call_operand.vmem [shape: f32[64,128], index: 6, kind: output, shape index: {1}]  }
   0x1   :  { %s24_s22 = sshll.u32 %s666_s21, 4  ;;  %s642_s25 = scalar_lea.hbm %s845_s3, 2048  ;;  %s25_s22 = int_to_ptr.vmem [resolvable:$true] %s24_s22 }
   0x2   :  { %p643_p0 = scmp.ne.s32.totalorder %s845_s3, %s642_s25  ;;  %p646_p1 = scmp.lt.u32.totalorder %s642_s25, %s845_s3 }
   0x4   :  { %p648_p2 = pnand %p646_p1, %p643_p0 }
   0x6   :  { %651 = shalt.err (!%p648_p2)
}
   0x7   :  { %s652_s30 = scalar_lea.vmem %s25_s22, 2048  ;;  %p657_p4 = scmp.lt.s32.totalorder %s25_s22, %s25_s22 }
   0x8   :  { %p653_p3 = scmp.ne.s32.totalorder %s25_s22, %s652_s30  ;;  %p658_p5 = scmp.lt.s32.totalorder %s652_s30, %s652_s30 }
   0xa   :  { %p659_p6 = por %p658_p5, %p657_p4 }
   0xc   :  { %p660_p7 = pnand %p659_p6, %p653_p3 }
   0xe   :  { %663 = shalt.err (!%p660_p7)
}
   0xf   :  { %s667_s7 = smov 128   ;;  %s668_s8 = smov 8  }
  0x10   :  { %30 = dma.hbm_to_vmem [thread:$0]  %s845_s3, 2048, %s25_s22, [#allocation3], %s667_s7, %s667_s7, %s668_s8  }
  0x11   :  { %664 = dma.done.wait [#allocation3], 2048  }
  0x12   :  { %665 = vsyncadd [#allocation3], 4294965248  ;;  %v44_v0 = vld [vmem:[%s843_s1] sm:$0xff]  ;;  %v45_v1 = vld [vmem:[%s843_s1 + $0x8] sm:$0xff] }
  0x13   :  { %v46_v2 = vld [vmem:[%s843_s1 + $0x10] sm:$0xff]  ;;  %v527_v3 = vpack.c.bf16 %v45_v1, %v44_v0  ;;  %v47_v4 = vld [vmem:[%s843_s1 + $0x18] sm:$0xff]  ;;  %v48_v6 = vld [vmem:[%s843_s1 + $0x20] sm:$0xff] }
  0x14   :  { %v531_v5 = vpack.c.bf16 %v47_v4, %v46_v2  ;;  %v49_v7 = vld [vmem:[%s843_s1 + $0x28] sm:$0xff]  ;;  %v36_v9 = vld [vmem:[%s842_s0] sm:$0xff]  ;;  %v50_v10 = vld [vmem:[%s843_s1 + $0x30] sm:$0xff] }
  0x15   :  { %528 = vmatprep.subr.bf16.mxu0 %v527_v3  ;;  %v535_v8 = vpack.c.bf16 %v49_v7, %v48_v6  ;;  %v51_v11 = vld [vmem:[%s843_s1 + $0x38] sm:$0xff]  ;;  %471 = vmatprep.mubr.f32.mxu0 %v36_v9  ;;  %v188_v12 = vld [vmem:[#allocation2] sm:$0xff]  ;;  %v189_v13 = vld [vmem:[#allocation2 + $0x8] sm:$0xff] }
  0x16   :  { %530 = vmatpush3.bf16.msra.mxu0 %v527_v3  ;;  %v190_v14 = vld [vmem:[#allocation2 + $0x10] sm:$0xff]  ;;  %v539_v15 = vpack.c.bf16 %v51_v11, %v50_v10  ;;  %v52_v16 = vld [vmem:[%s843_s1 + $0x40] sm:$0xff]  ;;  %v559_v17 = vpack.c.bf16 %v189_v13, %v188_v12  ;;  %v191_v18 = vld [vmem:[#allocation2 + $0x18] sm:$0xff] }
  0x17   :  { %532 = vmatprep.subr.bf16.mxu0 %v531_v5  ;;  %v53_v19 = vld [vmem:[%s843_s1 + $0x48] sm:$0xff]  ;;  %v563_v20 = vpack.c.bf16 %v191_v18, %v190_v14  ;;  %v192_v21 = vld [vmem:[#allocation2 + $0x20] sm:$0xff]  ;;  %v54_v24 = vld [vmem:[%s843_s1 + $0x50] sm:$0xff] }
  0x18   :  { %v193_v22 = vld [vmem:[#allocation2 + $0x28] sm:$0xff]  ;;  %560 = vmatprep.subr.bf16.mxu1 %v559_v17  ;;  %v543_v23 = vpack.c.bf16 %v53_v19, %v52_v16  ;;  %v55_v26 = vld [vmem:[%s843_s1 + $0x58] sm:$0xff]  ;;  %v194_v27 = vld [vmem:[#allocation2 + $0x30] sm:$0xff] }
  0x19   :  { %562 = vmatpush3.bf16.msra.mxu1 %v559_v17  ;;  %v567_v25 = vpack.c.bf16 %v193_v22, %v192_v21  ;;  %v195_v28 = vld [vmem:[#allocation2 + $0x38] sm:$0xff]  ;;  %v547_v29 = vpack.c.bf16 %v55_v26, %v54_v24  ;;  %v56_v31 = vld [vmem:[%s843_s1 + $0x60] sm:$0xff]  ;;  %v57_v32 = vld [vmem:[%s843_s1 + $0x68] sm:$0xff] }
  0x1a   :  { %534 = vmatpush3.bf16.msra.mxu0 %v531_v5  ;;  %564 = vmatprep.subr.bf16.mxu1 %v563_v20  ;;  %v571_v30 = vpack.c.bf16 %v195_v28, %v194_v27  ;;  %v551_v33 = vpack.c.bf16 %v57_v32, %v56_v31  ;;  %v58_v34 = vld [vmem:[%s843_s1 + $0x70] sm:$0xff]  ;;  %v59_v35 = vld [vmem:[%s843_s1 + $0x78] sm:$0xff]  ;;  %v37_v37 = vld [vmem:[%s842_s0 + $0x8] sm:$0xff] }
  0x1b   :  { %536 = vmatprep.subr.bf16.mxu0 %v535_v8  ;;  %v555_v36 = vpack.c.bf16 %v59_v35, %v58_v34  ;;  %v38_v38 = vld [vmem:[%s842_s0 + $0x10] sm:$0xff]  ;;  %v39_v39 = vld [vmem:[%s842_s0 + $0x18] sm:$0xff]  ;;  %v40_v40 = vld [vmem:[%s842_s0 + $0x20] sm:$0xff] }
  0x1c   :  { %v41_v41 = vld [vmem:[%s842_s0 + $0x28] sm:$0xff]  ;;  %v42_v42 = vld [vmem:[%s842_s0 + $0x30] sm:$0xff]  ;;  %v43_v43 = vld [vmem:[%s842_s0 + $0x38] sm:$0xff] }
  0x1d   :  { %566 = vmatpush3.bf16.msra.mxu1 %v563_v20  ;;  %v196_v44 = vld [vmem:[#allocation2 + $0x40] sm:$0xff]  ;;  %v197_v45 = vld [vmem:[#allocation2 + $0x48] sm:$0xff]  ;;  %v198_v47 = vld [vmem:[#allocation2 + $0x50] sm:$0xff] }
  0x1e   :  { %538 = vmatpush3.bf16.msra.mxu0 %v535_v8  ;;  %568 = vmatprep.subr.bf16.mxu1 %v567_v25  ;;  %v575_v46 = vpack.c.bf16 %v197_v45, %v196_v44  ;;  %v199_v48 = vld [vmem:[#allocation2 + $0x58] sm:$0xff]  ;;  %v200_v50 = vld [vmem:[#allocation2 + $0x60] sm:$0xff]  ;;  %v201_v51 = vld [vmem:[#allocation2 + $0x68] sm:$0xff] }
  0x1f   :  { %540 = vmatprep.subr.bf16.mxu0 %v539_v15  ;;  %v579_v49 = vpack.c.bf16 %v199_v48, %v198_v47  ;;  %v583_v52 = vpack.c.bf16 %v201_v51, %v200_v50  ;;  %v202_v53 = vld [vmem:[#allocation2 + $0x70] sm:$0xff]  ;;  %v203_v54 = vld [vmem:[#allocation2 + $0x78] sm:$0xff]  ;;  %v381_v56 = vld [vmem:[%s844_s2] ss:$0 sm:$0xff] }
  0x20   :  { %v587_v55 = vpack.c.bf16 %v203_v54, %v202_v53  ;;  %v382_v17 = vld [vmem:[%s846_s4] ss:$0 sm:$0xff] }
  0x21   :  { %570 = vmatpush3.bf16.msra.mxu1 %v567_v25 }
  0x22   :  { %542 = vmatpush3.bf16.msra.mxu0 %v539_v15  ;;  %572 = vmatprep.subr.bf16.mxu1 %v571_v30 }
  0x23   :  { %544 = vmatprep.subr.bf16.mxu0 %v543_v23 }
  0x25   :  { %574 = vmatpush3.bf16.msra.mxu1 %v571_v30 }
  0x26   :  { %546 = vmatpush3.bf16.msra.mxu0 %v543_v23  ;;  %576 = vmatprep.subr.bf16.mxu1 %v575_v46 }
  0x27   :  { %548 = vmatprep.subr.bf16.mxu0 %v547_v29 }
  0x29   :  { %578 = vmatpush3.bf16.msra.mxu1 %v575_v46 }
  0x2a   :  { %550 = vmatpush3.bf16.msra.mxu0 %v547_v29  ;;  %580 = vmatprep.subr.bf16.mxu1 %v579_v49 }
  0x2b   :  { %552 = vmatprep.subr.bf16.mxu0 %v551_v33 }
  0x2d   :  { %582 = vmatpush3.bf16.msra.mxu1 %v579_v49 }
  0x2e   :  { %554 = vmatpush3.bf16.msra.mxu0 %v551_v33  ;;  %584 = vmatprep.subr.bf16.mxu1 %v583_v52 }
  0x2f   :  { %556 = vmatprep.subr.bf16.mxu0 %v555_v36 }
  0x31   :  { %586 = vmatpush3.bf16.msra.mxu1 %v583_v52 }
  0x32   :  { %558 = vmatpush3.bf16.msra.mxu0 %v555_v36  ;;  %588 = vmatprep.subr.bf16.mxu1 %v587_v55 }
  0x35   :  { %472 = vmatmul.mubr.f32.vlgmr.msra.gmra.mrb[0].mxu0 %v37_v37  ;;  %590 = vmatpush3.bf16.msra.mxu1 %v587_v55 }
  0x36   :  { %474 = vmatprep.mubr.f32.mxu0 %v38_v38 }
  0x39   :  { %475 = vmatmul.mubr.f32.gmra.mrb[2].mxu0 %v39_v39 }
  0x3a   :  { %477 = vmatprep.mubr.f32.mxu0 %v40_v40 }
  0x3d   :  { %478 = vmatmul.mubr.f32.gmra.mrb[4].mxu0 %v41_v41 }
  0x3e   :  { %480 = vmatprep.mubr.f32.mxu0 %v42_v42 }
  0x41   :  { %481 = vmatmul.mubr.f32.gmra.mrb[6].mxu0 %v43_v43 }
 0x108   :  { %v473_v57 = vpop.f32.mrb[0].mxu0 }
 0x109   :  { %v139_v58 = vadd.f32 %v473_v57, %v381_v56  ;;  %v133_v59 = vpop.f32.mrb[1].mxu0 }
 0x10a   :  { %v134_v60 = vadd.f32 %v381_v56, %v133_v59 }
 0x10b   :  { %594 = vtanh.f32 %v139_v58 }
 0x10c   :  { %596 = vtanh.f32 %v134_v60  ;;  %v476_v61 = vpop.f32.mrb[2].mxu0 }
 0x10d   :  { %v149_v62 = vadd.f32 %v476_v61, %v381_v56  ;;  %v143_v63 = vpop.f32.mrb[3].mxu0 }
 0x10e   :  { %v144_v0 = vadd.f32 %v381_v56, %v143_v63 }
 0x10f   :  { %598 = vtanh.f32 %v149_v62 }
 0x110   :  { %600 = vtanh.f32 %v144_v0  ;;  %v479_v1 = vpop.f32.mrb[4].mxu0 }
 0x111   :  { %v159_v2 = vadd.f32 %v479_v1, %v381_v56  ;;  %v153_v3 = vpop.f32.mrb[5].mxu0 }
 0x112   :  { %v154_v4 = vadd.f32 %v381_v56, %v153_v3 }
 0x113   :  { %602 = vtanh.f32 %v159_v2 }
 0x114   :  { %604 = vtanh.f32 %v154_v4  ;;  %v482_v5 = vpop.f32.mrb[6].mxu0 }
 0x115   :  { %v595_v6 = vpop.eup %594  ;;  %v169_v7 = vadd.f32 %v482_v5, %v381_v56  ;;  %v163_v8 = vpop.f32.mrb[7].mxu0 }
 0x116   :  { %v597_v9 = vpop.eup %596  ;;  %181 = vst [vmem:[%s848_s6 + $0x8] sm:$0xff] %v595_v6  ;;  %v164_v10 = vadd.f32 %v381_v56, %v163_v8 }
 0x117   :  { %180 = vst [vmem:[%s848_s6] sm:$0xff] %v597_v9  ;;  %606 = vtanh.f32 %v169_v7  ;;  %515 = vmatprep.mubr.f32.mxu1 %v597_v9 }
 0x118   :  { %608 = vtanh.f32 %v164_v10  ;;  %516 = vmatmul.mubr.f32.vlgmr.msra.gmra.mrb[0].mxu1 %v595_v6 }
 0x119   :  { %v599_v11 = vpop.eup %598 }
 0x11a   :  { %v601_v12 = vpop.eup %600  ;;  %183 = vst [vmem:[%s848_s6 + $0x18] sm:$0xff] %v599_v11 }
 0x11b   :  { %182 = vst [vmem:[%s848_s6 + $0x10] sm:$0xff] %v601_v12  ;;  %518 = vmatprep.mubr.f32.mxu1 %v601_v12 }
 0x11c   :  { %519 = vmatmul.mubr.f32.gmra.mrb[2].mxu1 %v599_v11 }
 0x11d   :  { %v603_v13 = vpop.eup %602 }
 0x11e   :  { %v605_v14 = vpop.eup %604  ;;  %185 = vst [vmem:[%s848_s6 + $0x28] sm:$0xff] %v603_v13 }
 0x11f   :  { %184 = vst [vmem:[%s848_s6 + $0x20] sm:$0xff] %v605_v14  ;;  %521 = vmatprep.mubr.f32.mxu1 %v605_v14 }
 0x120   :  { %522 = vmatmul.mubr.f32.gmra.mrb[4].mxu1 %v603_v13 }
 0x121   :  { %v607_v15 = vpop.eup %606 }
 0x122   :  { %v609_v16 = vpop.eup %608  ;;  %187 = vst [vmem:[%s848_s6 + $0x38] sm:$0xff] %v607_v15 }
 0x123   :  { %186 = vst [vmem:[%s848_s6 + $0x30] sm:$0xff] %v609_v16  ;;  %524 = vmatprep.mubr.f32.mxu1 %v609_v16 }
 0x124   :  { %525 = vmatmul.mubr.f32.gmra.mrb[6].mxu1 %v607_v15 }
 0x1eb   :  { %v517_v18 = vpop.f32.mrb[0].mxu1 }
 0x1ec   :  { %v283_v19 = vadd.f32 %v517_v18, %v382_v17  ;;  %v277_v20 = vpop.f32.mrb[1].mxu1 }
 0x1ed   :  { %v278_v21 = vadd.f32 %v382_v17, %v277_v20 }
 0x1ee   :  { %v384_v22 = vmul.f32 -1.442695, %v283_v19 }
 0x1ef   :  { %v383_v23 = vmul.f32 -1.442695, %v278_v21  ;;  %v520_v24 = vpop.f32.mrb[2].mxu1 }
 0x1f0   :  { %610 = vpow2.f32 %v384_v22  ;;  %v293_v25 = vadd.f32 %v520_v24, %v382_v17  ;;  %v287_v26 = vpop.f32.mrb[3].mxu1 }
 0x1f1   :  { %612 = vpow2.f32 %v383_v23  ;;  %v288_v27 = vadd.f32 %v382_v17, %v287_v26 }
 0x1f2   :  { %v386_v28 = vmul.f32 -1.442695, %v293_v25 }
 0x1f3   :  { %v385_v29 = vmul.f32 -1.442695, %v288_v27  ;;  %v523_v30 = vpop.f32.mrb[4].mxu1 }
 0x1f4   :  { %614 = vpow2.f32 %v386_v28  ;;  %v303_v31 = vadd.f32 %v523_v30, %v382_v17  ;;  %v297_v32 = vpop.f32.mrb[5].mxu1 }
 0x1f5   :  { %616 = vpow2.f32 %v385_v29  ;;  %v298_v33 = vadd.f32 %v382_v17, %v297_v32 }
 0x1f6   :  { %v388_v34 = vmul.f32 -1.442695, %v303_v31 }
 0x1f7   :  { %v387_v35 = vmul.f32 -1.442695, %v298_v33  ;;  %v526_v36 = vpop.f32.mrb[6].mxu1 }
 0x1f8   :  { %618 = vpow2.f32 %v388_v34  ;;  %v313_v37 = vadd.f32 %v526_v36, %v382_v17  ;;  %v307_v38 = vpop.f32.mrb[7].mxu1 }
 0x1f9   :  { %620 = vpow2.f32 %v387_v35  ;;  %v308_v39 = vadd.f32 %v382_v17, %v307_v38 }
 0x1fa   :  { %v611_v40 = vpop.eup %610  ;;  %v390_v41 = vmul.f32 -1.442695, %v313_v37 }
 0x1fb   :  { %v613_v42 = vpop.eup %612  ;;  %v341_v43 = vadd.f32 1.0, %v611_v40  ;;  %v389_v44 = vmul.f32 -1.442695, %v308_v39 }
 0x1fc   :  { %v340_v45 = vadd.f32 1.0, %v613_v42  ;;  %622 = vpow2.f32 %v390_v41 }
 0x1fd   :  { %624 = vrcp.f32 %v341_v43 }
 0x1fe   :  { %v615_v46 = vpop.eup %614  ;;  %626 = vrcp.f32 %v340_v45 }
 0x1ff   :  { %v617_v47 = vpop.eup %616  ;;  %v343_v48 = vadd.f32 1.0, %v615_v46  ;;  %628 = vpow2.f32 %v389_v44 }
 0x200   :  { %v342_v49 = vadd.f32 1.0, %v617_v47 }
 0x201   :  { %630 = vrcp.f32 %v343_v48 }
 0x202   :  { %v619_v50 = vpop.eup %618  ;;  %632 = vrcp.f32 %v342_v49 }
 0x203   :  { %v621_v51 = vpop.eup %620  ;;  %v345_v52 = vadd.f32 1.0, %v619_v50 }
 0x204   :  { %v344_v53 = vadd.f32 1.0, %v621_v51 }
 0x205   :  { %634 = vrcp.f32 %v345_v52 }
 0x206   :  { %v623_v54 = vpop.eup %622  ;;  %636 = vrcp.f32 %v344_v53 }
 0x207   :  { %v625_v55 = vpop.eup %624  ;;  %v347_v56 = vadd.f32 1.0, %v623_v54 }
 0x208   :  { %v627_v57 = vpop.eup %626  ;;  %365 = vst [vmem:[%s847_s5 + $0x8] sm:$0xff] %v625_v55 }
 0x209   :  { %v629_v58 = vpop.eup %628  ;;  %364 = vst [vmem:[%s847_s5] sm:$0xff] %v627_v57  ;;  %638 = vrcp.f32 %v347_v56 }
 0x20a   :  { %v346_v59 = vadd.f32 1.0, %v629_v58 }
 0x20b   :  { %v631_v60 = vpop.eup %630 }
 0x20c   :  { %v633_v61 = vpop.eup %632  ;;  %367 = vst [vmem:[%s847_s5 + $0x18] sm:$0xff] %v631_v60  ;;  %640 = vrcp.f32 %v346_v59 }
 0x20d   :  { %366 = vst [vmem:[%s847_s5 + $0x10] sm:$0xff] %v633_v61 }
 0x20f   :  { %v635_v62 = vpop.eup %634 }
 0x210   :  { %v637_v63 = vpop.eup %636  ;;  %369 = vst [vmem:[%s847_s5 + $0x28] sm:$0xff] %v635_v62 }
 0x211   :  { %368 = vst [vmem:[%s847_s5 + $0x20] sm:$0xff] %v637_v63 }
 0x213   :  { %v639_v0 = vpop.eup %638 }
 0x214   :  { %371 = vst [vmem:[%s847_s5 + $0x38] sm:$0xff] %v639_v0 }
 0x216   :  { %v641_v1 = vpop.eup %640 }
 0x217   :  { %370 = vst [vmem:[%s847_s5 + $0x30] sm:$0xff] %v641_v1 }
 0x218   :  { %380 = vsyncpa [#allocation3], 1 }

</bundles_post_ra>
